<compile_context>
chip_gen: v7x
topology: tpu7x:2x2x1
jax: 0.10.0
libtpu: 0.0.40
codegen_flags: <defaults>
</compile_context>

<pallas_src>
import jax
import jax.numpy as jnp
from jax.experimental import pallas as pl
from jax.experimental.pallas import tpu as pltpu


def _round_up(x, m):
    return ((x + m - 1) // m) * m


def _is_v5_family():
    # v5e has no bf16 VPU/EUP and ~5x less MXU throughput than v6e/v7x; it is
    # the only generation where the stored-logits path / f32 exp is preferred.
    try:
        kind = jax.devices()[0].device_kind.lower()
    except Exception:
        return False
    return "v5" in kind


def _vmem_capacity_bytes():
    try:
        return int(pltpu.get_tpu_info().vmem_capacity_bytes)
    except Exception:
        return 64 * 1024 * 1024  # conservative: v7x per-TensorCore VMEM


def _derive_vmem_limit(tm, tn, d_model):
    # Double-buffered footprint of the heaviest pass, plus headroom for
    # compiler-internal scratch; clamped to the chip's physical VMEM.
    need = (
        2 * tm * d_model * 2       # x tiles (bf16)
        + 2 * d_model * tn * 2     # weight tiles (bf16)
        + 2 * tn * 4               # bias tiles (f32)
        + 2 * tm * tn * 4          # output tiles (f32)
        + 2 * tm * tn * 2          # bf16 logits intermediate (stored path)
        + 4 * tm * 4               # lse output + running max / sum-exp scratch
    )
    need = int(need * 1.25) + (4 * 1024 * 1024)
    cap = _vmem_capacity_bytes() - 4 * 1024 * 1024
    return max(32 * 1024 * 1024, min(need, cap))


# --------------------------------------------------------------------------
# Pass 1: (optionally store logits) + online row statistics -> log-sum-exp
# --------------------------------------------------------------------------
def _make_stats_kernel(store_logits, bf16_exp):
    def kernel(x_ref, w_ref, b_ref, *refs):
        if store_logits:
            logits_ref, lse_ref, m_sc, l_sc = refs
        else:
            lse_ref, m_sc, l_sc = refs

        j = pl.program_id(1)

        @pl.when(j == 0)
        def _():
            m_sc[...] = jnp.full_like(m_sc, -jnp.inf)
            l_sc[...] = jnp.zeros_like(l_sc)

        # bf16 x bf16 -> f32 accumulate on the MXU.
        logits = jnp.dot(x_ref[...], w_ref[...],
                         preferred_element_type=jnp.float32)
        logits = logits + b_ref[...]          # f32 bias, broadcast over rows
        if store_logits:
            logits_ref[...] = logits.astype(logits_ref.dtype)   # bf16 intermediate

        # Online max / sum-exp update (statistics stay f32).
        m_prev = m_sc[...]
        m_new = jnp.maximum(m_prev, jnp.max(logits, axis=-1, keepdims=True))
        shifted = logits - m_new
        if bf16_exp:
            # exp through the EUP in bf16 (v6e/v7x); sum accumulated in f32.
            e = jnp.exp(shifted.astype(jnp.bfloat16)).astype(jnp.float32)
        else:
            e = jnp.exp(shifted)
        l_sc[...] = (l_sc[...] * jnp.exp(m_prev - m_new)
                     + jnp.sum(e, axis=-1, keepdims=True))
        m_sc[...] = m_new

        @pl.when(j == pl.num_programs(1) - 1)
        def _():
            lse_ref[...] = m_sc[...] + jnp.log(l_sc[...])

    return kernel


# --------------------------------------------------------------------------
# Pass 2 (v5e path): re-read stored bf16 logits, normalize with final lse
# --------------------------------------------------------------------------
def _normalize_stored_kernel(logits_ref, lse_ref, o_ref):
    o_ref[...] = (logits_ref[...].astype(jnp.float32)
                  - lse_ref[...]).astype(o_ref.dtype)


# --------------------------------------------------------------------------
# Pass 2 (v6e / v7x path): recompute logits on the MXU, normalize, write out
# --------------------------------------------------------------------------
def _normalize_recompute_kernel(x_ref, w_ref, b_ref, lse_ref, o_ref):
    logits = jnp.dot(x_ref[...], w_ref[...], preferred_element_type=jnp.float32)
    o_ref[...] = (logits + b_ref[...] - lse_ref[...]).astype(o_ref.dtype)


# --------------------------------------------------------------------------
# One-time parameter preprocessing (hoisted out of the per-call path)
# --------------------------------------------------------------------------
def prepare_generator_params(w, b, *, tn=None):
    """w: (d_model, vocab) (= PyTorch proj.weight.T), b: (vocab,)."""
    d_model, vocab = w.shape
    if tn is None:
        # Lane-dense vocab tile, up to 1024 (fewer grid steps, bigger DMAs).
        tn = min(1024, _round_up(vocab, 128))
    vocab_p = _round_up(vocab, tn)
    if vocab_p != vocab:
        # Padded vocab columns: zero weights + very negative bias so they do
        # not perturb the row max / log-sum-exp (representable in bf16 too);
        # they are sliced off at the end.
        w = jnp.pad(w, ((0, 0), (0, vocab_p - vocab)))
        b = jnp.pad(b, (0, vocab_p - vocab), constant_values=-1e30)
    return {
        "w": w.astype(jnp.bfloat16),
        "b": b.reshape(1, vocab_p).astype(jnp.float32),
        "d_model": d_model,
        "vocab": vocab,
        "vocab_p": vocab_p,
        "tn": tn,
    }


def generator_forward(x, params, *, tm=None, recompute=None, bf16_exp=None):
    """x: (..., d_model); params from prepare_generator_params."""
    w_bf = params["w"]
    b2d = params["b"]
    d_model = params["d_model"]
    vocab = params["vocab"]
    vocab_p = params["vocab_p"]
    tn = params["tn"]

    v5 = _is_v5_family()
    if recompute is None:
        recompute = not v5     # v5e: keep the stored (bf16) logits path
    if bf16_exp is None:
        bf16_exp = not v5      # v5e VPU/EUP has no bf16

    lead_shape = x.shape[:-1]
    x2d = x.reshape(-1, d_model)
    n_rows = x2d.shape[0]

    # ---- row tile selection ---------------------------------------------
    if tm is None:
        if n_rows <= 256:
            tm = _round_up(max(n_rows, 1), 16)   # bf16 packs 16 sublanes/vreg
        else:
            # Large row tile (fewer weight re-streams from HBM), but keep at
            # least 2 row blocks so both v7x TensorCores get work.
            tm = min(512, _round_up((n_rows + 1) // 2, 16))
    rows_p = _round_up(n_rows, tm)

    if rows_p != n_rows:
        x2d = jnp.pad(x2d, ((0, rows_p - n_rows), (0, 0)))
    x_bf = x2d.astype(jnp.bfloat16)

    grid = (rows_p // tm, vocab_p // tn)
    vmem_limit = _derive_vmem_limit(tm, tn, d_model)

    # Shared BlockSpecs.
    x_spec = pl.BlockSpec((tm, d_model), lambda i, j: (i, 0))
    w_spec = pl.BlockSpec((d_model, tn), lambda i, j: (0, j))
    b_spec = pl.BlockSpec((1, tn), lambda i, j: (0, j))
    lse_spec = pl.BlockSpec((tm, 1), lambda i, j: (i, 0))
    tile_spec = pl.BlockSpec((tm, tn), lambda i, j: (i, j))

    matmul_flops = 2 * rows_p * d_model * vocab_p
    w_stream_bytes = (rows_p // tm) * w_bf.size * 2   # W re-streamed per row tile

    # ---- pass 1: (optional bf16 logits +) per-row log-sum-exp -------------
    if recompute:
        out_shape1 = jax.ShapeDtypeStruct((rows_p, 1), jnp.float32)
        out_specs1 = lse_spec
        bytes1 = x_bf.size * 2 + w_stream_bytes + b2d.size * 4 + rows_p * 4
    else:
        out_shape1 = (jax.ShapeDtypeStruct((rows_p, vocab_p), jnp.bfloat16),
                      jax.ShapeDtypeStruct((rows_p, 1), jnp.float32))
        out_specs1 = [tile_spec, lse_spec]
        bytes1 = (x_bf.size * 2 + w_stream_bytes + b2d.size * 4
                  + rows_p * vocab_p * 2 + rows_p * 4)

    pass1_out = pl.pallas_call(
        _make_stats_kernel(store_logits=not recompute, bf16_exp=bf16_exp),
        out_shape=out_shape1,
        grid_spec=pltpu.PrefetchScalarGridSpec(
            num_scalar_prefetch=0,
            grid=grid,
            in_specs=[x_spec, w_spec, b_spec],
            out_specs=out_specs1,
            scratch_shapes=[
                pltpu.VMEM((tm, 1), jnp.float32),   # running max
                pltpu.VMEM((tm, 1), jnp.float32),   # running sum-exp
            ],
        ),
        compiler_params=pltpu.CompilerParams(
            dimension_semantics=("parallel", "arbitrary"),
            vmem_limit_bytes=vmem_limit,
        ),
        cost_estimate=pl.CostEstimate(
            flops=matmul_flops,
            transcendentals=rows_p * vocab_p,
            bytes_accessed=bytes1,
        ),
    )(x_bf, w_bf, b2d)

    out_dtype = x.dtype

    # ---- pass 2: normalize with the final per-row log-sum-exp -------------
    if recompute:
        lse = pass1_out
        out = pl.pallas_call(
            _normalize_recompute_kernel,
            out_shape=jax.ShapeDtypeStruct((rows_p, vocab_p), out_dtype),
            grid_spec=pltpu.PrefetchScalarGridSpec(
                num_scalar_prefetch=0,
                grid=grid,
                in_specs=[x_spec, w_spec, b_spec, lse_spec],
                out_specs=tile_spec,
            ),
            compiler_params=pltpu.CompilerParams(
                dimension_semantics=("parallel", "parallel"),
                vmem_limit_bytes=vmem_limit,
            ),
            cost_estimate=pl.CostEstimate(
                flops=matmul_flops + rows_p * vocab_p,
                transcendentals=0,
                bytes_accessed=(x_bf.size * 2 + w_stream_bytes + b2d.size * 4
                                + rows_p * 4 + rows_p * vocab_p * 4),
            ),
        )(x_bf, w_bf, b2d, lse)
    else:
        logits_bf, lse = pass1_out
        out = pl.pallas_call(
            _normalize_stored_kernel,
            out_shape=jax.ShapeDtypeStruct((rows_p, vocab_p), out_dtype),
            grid_spec=pltpu.PrefetchScalarGridSpec(
                num_scalar_prefetch=0,
                grid=grid,
                in_specs=[tile_spec, lse_spec],
                out_specs=tile_spec,
            ),
            compiler_params=pltpu.CompilerParams(
                dimension_semantics=("parallel", "parallel"),
                vmem_limit_bytes=vmem_limit,
            ),
            cost_estimate=pl.CostEstimate(
                flops=rows_p * vocab_p,
                transcendentals=0,
                bytes_accessed=(rows_p * vocab_p * 2 + rows_p * 4
                                + rows_p * vocab_p * 4),
            ),
        )(logits_bf, lse)

    out = out[:n_rows, :vocab]
    return out.reshape(*lead_shape, vocab)


def generator_reference(x, w, b):
    logits = jnp.dot(x, w, precision=jax.lax.Precision.HIGHEST) + b
    return jax.nn.log_softmax(logits, axis=-1)


if __name__ == "__main__":
    # Shapes consistent with the module: batch=2, seq=8, d_model=32, vocab=128
    batch, seq, d_model, vocab = 2, 8, 32, 128

    key = jax.random.PRNGKey(0)
    kx, kw, kb = jax.random.split(key, 3)

    # PyTorch Linear default init: U(-1/sqrt(fan_in), +1/sqrt(fan_in))
    bound = 1.0 / (d_model ** 0.5)
    w = jax.random.uniform(kw, (d_model, vocab), jnp.float32, -bound, bound)
    b = jax.random.uniform(kb, (vocab,), jnp.float32, -bound, bound)
    x = jax.random.normal(kx, (batch, seq, d_model), jnp.float32)

    params = prepare_generator_params(w, b)   # one-time weight pad + bf16 cast
    y = generator_forward(x, params)
    jax.block_until_ready(y)

    y_ref = generator_reference(x, w, b)
    assert y.shape == (batch, seq, vocab)
    # bf16 matmul inputs (f32 accumulation) -> loosened tolerance vs f32 ref.
    max_err = float(jnp.max(jnp.abs(y - y_ref)))
    assert max_err < 5e-2, f"max abs error {max_err}"

    # Second check: exercises row/vocab padding, a multi-tile online-softmax
    # grid, and BOTH pass-2 variants (stored bf16 logits and recompute).
    d2, v2, rows2 = 48, 380, 40
    k1, k2, k3 = jax.random.split(jax.random.PRNGKey(1), 3)
    w2 = jax.random.uniform(k1, (d2, v2), jnp.float32, -0.2, 0.2)
    b2 = jax.random.uniform(k2, (v2,), jnp.float32, -0.2, 0.2)
    x2 = jax.random.normal(k3, (rows2, d2), jnp.float32)
    params2 = prepare_generator_params(w2, b2, tn=128)   # force 3 vocab tiles
    ref2 = generator_reference(x2, w2, b2)
    for recomp in (False, True):
        y2 = generator_forward(x2, params2, recompute=recomp)
        jax.block_until_ready(y2)
        err2 = float(jnp.max(jnp.abs(y2 - ref2)))
        assert err2 < 5e-2, f"recompute={recomp} max abs error {err2}"

    print("KERNEL_OK")
</pallas_src>

<mosaic_0001>
module attributes {stable_mosaic.version = 11 : i64} {
  func.func @kernel(%arg0: i32, %arg1: i32, %arg2: memref<16x32xbf16, #tpu.memory_space<vmem>>, %arg3: memref<32x128xbf16, #tpu.memory_space<vmem>>, %arg4: memref<1x128xf32, #tpu.memory_space<vmem>>, %arg5: memref<16x1xf32, #tpu.memory_space<vmem>>, %arg6: memref<16x1xf32, #tpu.memory_space<vmem>>, %arg7: memref<16x1xf32, #tpu.memory_space<vmem>>) attributes {dimension_semantics = [#tpu.dimension_semantics<parallel>, #tpu.dimension_semantics<arbitrary>], iteration_bounds = array<i64: 1, 1>, scalar_prefetch = 0 : i64, scratch_operands = 2 : i64, tpu.core_type = #tpu.core_type<tc>, window_params = [{transform_indices = @transform_0, window_bounds = array<i64: 16, 32>}, {transform_indices = @transform_1, window_bounds = array<i64: 32, 128>}, {transform_indices = @transform_2, window_bounds = array<i64: 1, 128>}, {transform_indices = @transform_3, window_bounds = array<i64: 16, 1>}]} {
    %c0_i32 = arith.constant 0 : i32
    %0 = arith.cmpi eq, %arg1, %c0_i32 : i32
    %1 = arith.extui %0 : i1 to i32
    %c0_i32_0 = arith.constant 0 : i32
    %2 = arith.cmpi ne, %1, %c0_i32_0 : i32
    scf.if %2 {
      %cst_18 = arith.constant 0xFF800000 : f32
      %30 = vector.broadcast %cst_18 : f32 to vector<16x1xf32>
      %c0_19 = arith.constant 0 : index
      %c0_20 = arith.constant 0 : index
      %31 = vector.load %arg6[%c0_19, %c0_20] : memref<16x1xf32, #tpu.memory_space<vmem>>, vector<16x1xf32>
      tpu.vector_store %arg6[%c0_19, %c0_20], %30 {strides = array<i32>} : memref<16x1xf32, #tpu.memory_space<vmem>>, vector<16x1xf32>,
      %cst_21 = arith.constant 0.000000e+00 : f32
      %32 = vector.broadcast %cst_21 : f32 to vector<16x1xf32>
      %c0_22 = arith.constant 0 : index
      %c0_23 = arith.constant 0 : index
      %33 = vector.load %arg7[%c0_22, %c0_23] : memref<16x1xf32, #tpu.memory_space<vmem>>, vector<16x1xf32>
      tpu.vector_store %arg7[%c0_22, %c0_23], %32 {strides = array<i32>} : memref<16x1xf32, #tpu.memory_space<vmem>>, vector<16x1xf32>,
    } else {
    }
    %c0 = arith.constant 0 : index
    %c0_1 = arith.constant 0 : index
    %3 = vector.load %arg2[%c0, %c0_1] : memref<16x32xbf16, #tpu.memory_space<vmem>>, vector<16x32xbf16>
    %c0_2 = arith.constant 0 : index
    %c0_3 = arith.constant 0 : index
    %4 = vector.load %arg3[%c0_2, %c0_3] : memref<32x128xbf16, #tpu.memory_space<vmem>>, vector<32x128xbf16>
    %cst = arith.constant dense<0.000000e+00> : vector<16x128xf32>
    %5 = tpu.matmul %3, %4, %cst {dimension_numbers = #tpu.dot_dimension_numbers<[1], [0], [0], [1], [0, 0, 1, 1], [], []>} : vector<16x32xbf16>, vector<32x128xbf16>, vector<16x128xf32> -> vector<16x128xf32>
    %c0_4 = arith.constant 0 : index
    %c0_5 = arith.constant 0 : index
    %6 = vector.load %arg4[%c0_4, %c0_5] : memref<1x128xf32, #tpu.memory_space<vmem>>, vector<1x128xf32>
    %7 = vector.broadcast %6 : vector<1x128xf32> to vector<16x128xf32>
    %8 = arith.addf %5, %7 : vector<16x128xf32>
    %c0_6 = arith.constant 0 : index
    %c0_7 = arith.constant 0 : index
    %9 = vector.load %arg6[%c0_6, %c0_7] : memref<16x1xf32, #tpu.memory_space<vmem>>, vector<16x1xf32>
    %cst_8 = arith.constant dense<0xFF800000> : vector<16xf32>
    %10 = vector.multi_reduction <maximumf>, %8, %cst_8 [1] : vector<16x128xf32> to vector<16xf32>
    %11 = vector.shape_cast %10 : vector<16xf32> to vector<16x1xf32>
    %12 = arith.maximumf %9, %11 : vector<16x1xf32>
    %13 = vector.broadcast %12 : vector<16x1xf32> to vector<16x128xf32>
    %14 = arith.subf %8, %13 : vector<16x128xf32>
    %15 = arith.truncf %14 : vector<16x128xf32> to vector<16x128xbf16>
    %16 = math.exp %15 : vector<16x128xbf16>
    %17 = arith.extf %16 : vector<16x128xbf16> to vector<16x128xf32>
    %c0_9 = arith.constant 0 : index
    %c0_10 = arith.constant 0 : index
    %18 = vector.load %arg7[%c0_9, %c0_10] : memref<16x1xf32, #tpu.memory_space<vmem>>, vector<16x1xf32>
    %19 = arith.subf %9, %12 : vector<16x1xf32>
    %20 = math.exp %19 : vector<16x1xf32>
    %21 = arith.mulf %18, %20 : vector<16x1xf32>
    %cst_11 = arith.constant dense<0.000000e+00> : vector<16xf32>
    %22 = vector.multi_reduction <add>, %17, %cst_11 [1] : vector<16x128xf32> to vector<16xf32>
    %23 = vector.shape_cast %22 : vector<16xf32> to vector<16x1xf32>
    %24 = arith.addf %21, %23 : vector<16x1xf32>
    %c0_12 = arith.constant 0 : index
    %c0_13 = arith.constant 0 : index
    %25 = vector.load %arg7[%c0_12, %c0_13] : memref<16x1xf32, #tpu.memory_space<vmem>>, vector<16x1xf32>
    tpu.vector_store %arg7[%c0_12, %c0_13], %24 {strides = array<i32>} : memref<16x1xf32, #tpu.memory_space<vmem>>, vector<16x1xf32>,
    %c0_14 = arith.constant 0 : index
    %c0_15 = arith.constant 0 : index
    %26 = vector.load %arg6[%c0_14, %c0_15] : memref<16x1xf32, #tpu.memory_space<vmem>>, vector<16x1xf32>
    tpu.vector_store %arg6[%c0_14, %c0_15], %12 {strides = array<i32>} : memref<16x1xf32, #tpu.memory_space<vmem>>, vector<16x1xf32>,
    %c0_i32_16 = arith.constant 0 : i32
    %27 = arith.cmpi eq, %arg1, %c0_i32_16 : i32
    %28 = arith.extui %27 : i1 to i32
    %c0_i32_17 = arith.constant 0 : i32
    %29 = arith.cmpi ne, %28, %c0_i32_17 : i32
    scf.if %29 {
      %c0_18 = arith.constant 0 : index
      %c0_19 = arith.constant 0 : index
      %30 = vector.load %arg6[%c0_18, %c0_19] : memref<16x1xf32, #tpu.memory_space<vmem>>, vector<16x1xf32>
      %c0_20 = arith.constant 0 : index
      %c0_21 = arith.constant 0 : index
      %31 = vector.load %arg7[%c0_20, %c0_21] : memref<16x1xf32, #tpu.memory_space<vmem>>, vector<16x1xf32>
      %32 = math.log %31 : vector<16x1xf32>
      %33 = arith.addf %30, %32 : vector<16x1xf32>
      %c0_22 = arith.constant 0 : index
      %c0_23 = arith.constant 0 : index
      %34 = vector.load %arg5[%c0_22, %c0_23] : memref<16x1xf32, #tpu.memory_space<vmem>>, vector<16x1xf32>
      tpu.vector_store %arg5[%c0_22, %c0_23], %33 {strides = array<i32>} : memref<16x1xf32, #tpu.memory_space<vmem>>, vector<16x1xf32>,
    } else {
    }
    return
  }
  func.func @transform_0(%arg0: i32, %arg1: i32) -> (i32, i32) {
    %c0_i32 = arith.constant 0 : i32
    %c0_i32_0 = arith.constant 0 : i32
    return %arg0, %c0_i32 : i32, i32
  }
  func.func @transform_1(%arg0: i32, %arg1: i32) -> (i32, i32) {
    %c0_i32 = arith.constant 0 : i32
    %c0_i32_0 = arith.constant 0 : i32
    return %c0_i32, %arg1 : i32, i32
  }
  func.func @transform_2(%arg0: i32, %arg1: i32) -> (i32, i32) {
    %c0_i32 = arith.constant 0 : i32
    %c0_i32_0 = arith.constant 0 : i32
    return %c0_i32, %arg1 : i32, i32
  }
  func.func @transform_3(%arg0: i32, %arg1: i32) -> (i32, i32) {
    %c0_i32 = arith.constant 0 : i32
    %c0_i32_0 = arith.constant 0 : i32
    return %arg0, %c0_i32 : i32, i32
  }
}

</mosaic_0001>

<bundles_post_ra>
// kernel: tpu_custom_call.1
= control target key start
LH: loop header
LB: loop body
LE: loop exit
PB: predicated region body
PF: predicated region fallthrough
CT: control target
= control target key end

     0   :  { %8 = vsyncpa [#allocation5], 0  ;;  %s353_s0 = inlined_call_operand.hbm [shape: bf16[16,32], index: 0, kind: input, shape index: {}]   ;;  %s354_s1 = inlined_call_operand.hbm [shape: bf16[32,128], index: 1, kind: input, shape index: {}]   ;;  %s355_s2 = inlined_call_operand.vmem [shape: f32[1,128], index: 2, kind: input, shape index: {}]   ;;  %s356_s3 = inlined_call_operand.vmem [shape: f32[16,1], index: 3, kind: output, shape index: {}]  }
   0x1   :  { %9 = vsyncpa [#allocation7], 0  ;;  %s282_s12 = smov [#allocation4]   ;;  %s234_s16 = scalar_lea.hbm %s353_s0, 128 }
   0x2   :  { %s15_s13 = sshll.u32 %s282_s12, 4  ;;  %p235_p0 = scmp.ne.s32.totalorder %s353_s0, %s234_s16  ;;  %s16_s13 = int_to_ptr.vmem [resolvable:$true] %s15_s13 }
   0x3   :  { %p238_p1 = scmp.lt.u32.totalorder %s234_s16, %s353_s0 }
   0x5   :  { %p240_p2 = pnand %p238_p1, %p235_p0 }
   0x7   :  { %243 = shalt.err (!%p240_p2)
}
   0x8   :  { %s244_s21 = scalar_lea.vmem %s16_s13, 128  ;;  %p249_p4 = scmp.lt.s32.totalorder %s16_s13, %s16_s13 }
   0x9   :  { %p245_p3 = scmp.ne.s32.totalorder %s16_s13, %s244_s21  ;;  %p250_p5 = scmp.lt.s32.totalorder %s244_s21, %s244_s21 }
   0xb   :  { %p251_p6 = por %p250_p5, %p249_p4 }
   0xd   :  { %p252_p7 = pnand %p251_p6, %p245_p3 }
   0xf   :  { %255 = shalt.err (!%p252_p7)
}
  0x10   :  { %s283_s22 = smov 64   ;;  %s284_s23 = smov 4  }
  0x11   :  { %21 = dma.hbm_to_vmem [thread:$0]  %s353_s0, 128, %s16_s13, [#allocation5], %s283_s22, %s283_s22, %s284_s23  }
  0x12   :  { %s285_s26 = smov [#allocation6]   ;;  %s256_s30 = scalar_lea.hbm %s354_s1, 256 }
  0x13   :  { %s27_s27 = sshll.u32 %s285_s26, 4  ;;  %p257_p8 = scmp.ne.s32.totalorder %s354_s1, %s256_s30  ;;  %s28_s27 = int_to_ptr.vmem [resolvable:$true] %s27_s27 }
  0x14   :  { %p260_p9 = scmp.lt.u32.totalorder %s256_s30, %s354_s1 }
  0x16   :  { %p262_p10 = pnand %p260_p9, %p257_p8 }
  0x18   :  { %265 = shalt.err (!%p262_p10)
}
  0x19   :  { %s266_s8 = scalar_lea.vmem %s28_s27, 256  ;;  %p271_p12 = scmp.lt.s32.totalorder %s28_s27, %s28_s27 }
  0x1a   :  { %p267_p11 = scmp.ne.s32.totalorder %s28_s27, %s266_s8  ;;  %p272_p13 = scmp.lt.s32.totalorder %s266_s8, %s266_s8 }
  0x1c   :  { %p273_p0 = por %p272_p13, %p271_p12 }
  0x1e   :  { %p274_p1 = pnand %p273_p0, %p267_p11 }
  0x20   :  { %277 = shalt.err (!%p274_p1)
}
  0x21   :  { %33 = dma.hbm_to_vmem [thread:$0]  %s354_s1, 256, %s28_s27, [#allocation7], %s283_s22, %s283_s22, %s284_s23  }
  0x22   :  { %278 = dma.done.wait [#allocation5], 128  }
  0x23   :  { %279 = vsyncadd [#allocation5], 4294967168 }
  0x24   :  { %280 = dma.done.wait [#allocation7], 256  }
  0x25   :  { %281 = vsyncadd [#allocation7], 4294967040  ;;  %vm47_vm0 = vcmask 7168   ;;  %v286_v0 = vmov 0.0   ;;  %vm287_vm1 = vmmov 0   ;;  %v221_v1 = vld [vmem:[#allocation6] sm:$0xff]  }
  0x26   :  { %50 = vst.msk [vmem:[#allocation3] sm:$0xff] %vm47_vm0, %v286_v0  ;;  %51 = vst.msk [vmem:[#allocation3 + $0x8] sm:$0xff] %vm47_vm0, %v286_v0  ;;  %203 = vmatprep.subr.bf16.mxu0 %v286_v0  ;;  %207 = vmatprep.mubr.msk.bf16.mxu0 %vm287_vm1, %v286_v0  ;;  %v222_v2 = vld [vmem:[#allocation6 + $0x8] sm:$0xff]   ;;  %v223_v3 = vld [vmem:[#allocation4] sm:$0xff]   ;;  %vm82_vm2 = vcmask 261120   ;;  %v288_v4 = vmov -inf  }
  0x27   :  { %204 = vmatpush3.bf16.msra.mxu0 %v221_v1  ;;  %48 = vst.msk [vmem:[#allocation2] sm:$0xff] %vm47_vm0, %v288_v4  ;;  %49 = vst.msk [vmem:[#allocation2 + $0x8] sm:$0xff] %vm47_vm0, %v288_v4  ;;  %v195_v5 = vld [vmem:[%s355_s2] ss:$0 sm:$0xff]  ;;  %v289_v12 = vmov 0  }
  0x28   :  { %205 = vmatprep.subr.bf16.mxu0 %v286_v0  ;;  %219 = vset.pattern.permute.xlu1 %v289_v12 }
  0x29   :  { %220 = vset.pattern.permute.xlu0 %v289_v12 }
  0x2b   :  { %206 = vmatpush3.bf16.msra.mxu0 %v222_v2 }
  0x2d   :  { %v154_v34 = vld [vmem:[#allocation3 + $0x8] sm:$0xff]  ;;  %v153_v35 = vld [vmem:[#allocation3] sm:$0xff] }
  0x2e   :  { %208 = vmatmul.mubr.msk.bf16.vlgmr.msra.gmra.mrb[0].mxu0 %vm82_vm2, %v223_v3  ;;  %v127_v13 = vld [vmem:[#allocation2] sm:$0xff]  ;;  %v128_v16 = vld [vmem:[#allocation2 + $0x8] sm:$0xff] }
 0x101   :  { %v120_v6 = vpop.f32.mrb[0].mxu0 }
 0x102   :  { %v121_v7 = vadd.f32 %v195_v5, %v120_v6  ;;  %v209_v8 = vpop.f32.mrb[1].mxu0 }
 0x103   :  { %v123_v9 = vpop.f32.mrb[2].mxu0 }
 0x104   :  { %129 = vmax.xlane.f32.xlu0 %v121_v7  ;;  %v210_v10 = vpop.f32.mrb[3].mxu0  ;;  %v124_v11 = vadd.f32 %v195_v5, %v123_v9 }
 0x108   :  { %131 = vmax.xlane.f32.xlu0 %v124_v11 }
 0x191   :  { %v130_v14 = vpop.xlane.xlu0 %129 }
 0x192   :  { %v133_v15 = vmax.f32 %v127_v13, %v130_v14 }
 0x194   :  { %v155_v17 = vsub.f32 %v127_v13, %v133_v15  ;;  %172 = vst.msk [vmem:[#allocation2] sm:$0xff] %vm47_vm0, %v133_v15  ;;  %137 = vperm.xlu1 %219, %v133_v15  }
 0x195   :  { %v132_v18 = vpop.xlane.xlu0 %131 }
 0x196   :  { %v134_v19 = vmax.f32 %v128_v16, %v132_v18  ;;  %v157_v30 = vmul.f32 1.442695, %v155_v17 }
 0x198   :  { %v156_v20 = vsub.f32 %v128_v16, %v134_v19  ;;  %173 = vst.msk [vmem:[#allocation2 + $0x8] sm:$0xff] %vm47_vm0, %v134_v19  ;;  %142 = vperm.xlu1 %219, %v134_v19  }
 0x19a   :  { %v159_v31 = vmul.f32 1.442695, %v156_v20 }
 0x19b   :  { %v177_v49 = vld [vmem:[#allocation2] sm:$0xff] }
 0x19f   :  { %v178_v47 = vld [vmem:[#allocation2 + $0x8] sm:$0xff] }
 0x213   :  { %v138_v21 = vpop.permute.xlu1 %137 }
 0x214   :  { %v145_v23 = vsub.f32 %v121_v7, %v138_v21 }
 0x217   :  { %v143_v22 = vpop.permute.xlu1 %142 }
 0x218   :  { %v146_v24 = vsub.f32 %v124_v11, %v143_v22 }
 0x21a   :  { %v147_v25 = vpack.c.bf16 %v146_v24, %v145_v23 }
 0x21c   :  { %v149_v26 = vmul.bf16 1069105081, %v147_v25 }
 0x21e   :  { %224 = vpow.bf16 %v149_v26 }
 0x21f   :  { %226 = vpow2.f32 %v157_v30 }
 0x220   :  { %228 = vpow2.f32 %v159_v31 }
 0x229   :  { %v225_v27 = vpop.eup %224 }
 0x22a   :  { %v152_v28 = vunpack.c.h.bf16 %v225_v27  ;;  %v151_v29 = vunpack.c.l.bf16 %v225_v27  ;;  %v227_v32 = vpop.eup %226 }
 0x22b   :  { %v229_v33 = vpop.eup %228  ;;  %v161_v37 = vmul.f32 %v227_v32, %v153_v35 }
 0x22c   :  { %165 = vadd.xlane.f32.xlu1 %v152_v28  ;;  %163 = vadd.xlane.f32.xlu0 %v151_v29  ;;  %v162_v36 = vmul.f32 %v229_v33, %v154_v34 }
 0x2b9   :  { %v166_v38 = vpop.xlane.xlu1 %165  ;;  %v164_v39 = vpop.xlane.xlu0 %163 }
 0x2ba   :  { %v168_v40 = vadd.f32 %v166_v38, %v162_v36  ;;  %v167_v41 = vadd.f32 %v164_v39, %v161_v37 }
 0x2bc   :  { %171 = vst.msk [vmem:[#allocation3 + $0x8] sm:$0xff] %vm47_vm0, %v168_v40  ;;  %170 = vst.msk [vmem:[#allocation3] sm:$0xff] %vm47_vm0, %v167_v41 }
 0x2c3   :  { %v180_v42 = vld [vmem:[#allocation3 + $0x8] sm:$0xff]  ;;  %v179_v43 = vld [vmem:[#allocation3] sm:$0xff] }
 0x2c4   :  { %230 = vlog2.f32 %v180_v42 }
 0x2c5   :  { %232 = vlog2.f32 %v179_v43 }
 0x2ce   :  { %v231_v44 = vpop.eup %230 }
 0x2cf   :  { %v233_v45 = vpop.eup %232  ;;  %v184_v46 = vmul.f32 0.6931472, %v231_v44 }
 0x2d0   :  { %v182_v48 = vmul.f32 0.6931472, %v233_v45 }
 0x2d1   :  { %v186_v50 = vadd.f32 %v184_v46, %v178_v47 }
 0x2d2   :  { %v185_v51 = vadd.f32 %v182_v48, %v177_v49 }
 0x2d3   :  { %188 = vst.msk [vmem:[%s356_s3 + $0x8] sm:$0xff] %vm47_vm0, %v186_v50 }
 0x2d4   :  { %187 = vst.msk [vmem:[%s356_s3] sm:$0xff] %vm47_vm0, %v185_v51 }
 0x2d5   :  { %193 = vsyncpa [#allocation5], 1 }
 0x2d6   :  { %194 = vsyncpa [#allocation7], 1 }

</bundles_post_ra>
